<compile_context>
chip_gen: v5e
topology: v5e:2x2
jax: 0.10.0
libtpu: 0.0.40
codegen_flags: <defaults>
</compile_context>

<pallas_src>
import functools

import numpy as np
import jax
import jax.numpy as jnp
from jax.experimental import pallas as pl
from jax.experimental.pallas import tpu as pltpu


# ---------------------------------------------------------------------------
# Host-side construction of the (deterministic, parameter-free) operator.
# ---------------------------------------------------------------------------
def _adaptive_avg_pool_matrix(in_size: int, out_size: int) -> np.ndarray:
    """P (out_size, in_size): adaptive average pooling along one axis."""
    P = np.zeros((out_size, in_size), np.float64)
    for i in range(out_size):
        start = (i * in_size) // out_size
        end = -((-(i + 1) * in_size) // out_size)  # ceil((i+1)*in/out)
        P[i, start:end] = 1.0 / float(end - start)
    return P


def _bilinear_upsample_matrix(in_size: int, out_size: int) -> np.ndarray:
    """U (out_size, in_size): bilinear interp, PyTorch align_corners=False."""
    U = np.zeros((out_size, in_size), np.float64)
    scale = in_size / out_size
    for o in range(out_size):
        src = max(scale * (o + 0.5) - 0.5, 0.0)
        x0 = int(np.floor(src))
        x1 = min(x0 + 1, in_size - 1)
        lam1 = src - x0
        U[o, x0] += 1.0 - lam1
        U[o, x1] += lam1
    return U


def _scale_matrices(H: int, W: int, scales):
    """Per-scale row operator A_s (H,H) and column operator B_s (W,W)."""
    A_list, B_list = [], []
    for s in scales:
        A_list.append(_bilinear_upsample_matrix(s, H) @ _adaptive_avg_pool_matrix(H, s))
        B_list.append(_bilinear_upsample_matrix(s, W) @ _adaptive_avg_pool_matrix(W, s))
    return A_list, B_list


def _build_operator_t(H: int, W: int, scales) -> jnp.ndarray:
    """K^T with K = I_{HW} + sum_s kron(A_s, B_s)  (row-major image flattening)."""
    HW = H * W
    K = np.eye(HW, dtype=np.float64)
    A_list, B_list = _scale_matrices(H, W, scales)
    for A, B in zip(A_list, B_list):
        K += np.kron(A, B)
    return jnp.asarray(K.T, jnp.float32)


# ---------------------------------------------------------------------------
# Pallas kernel: one MXU matmul per grid step, lane-dense (last dim = H*W).
# ---------------------------------------------------------------------------
def _spp_kernel(x_ref, kt_ref, o_ref):
    # (blk, HW) @ (HW, HW) -> (blk, HW); residual + all scales folded into K.
    o_ref[...] = jnp.dot(
        x_ref[...].astype(jnp.float32), kt_ref[...],
        preferred_element_type=jnp.float32).astype(o_ref.dtype)


def _round_up(v: int, m: int) -> int:
    return ((v + m - 1) // m) * m


@functools.partial(jax.jit, static_argnames=("scales",))
def spatial_pyramid_pooling(x, scales=(1, 2, 3, 6)):
    """x: (N, C, H, W) -> (N, C, H, W).  Equivalent to the PyTorch module (mode='avg')."""
    # TODO(synk): mode='max' (AdaptiveMaxPool2d) is not a linear operator and is
    # not implemented by this kernel.
    N, C, H, W = x.shape
    HW = H * W
    # TODO(synk): for H*W > 1024 the (HW, HW) Kron operator no longer fits VMEM
    # comfortably (esp. v7x's 64 MiB); fall back to a stacked A_cat/Bt_cat kernel.
    assert HW <= 1024, "Kron-operator path is sized for H*W <= 1024"

    Kt = _build_operator_t(H, W, scales)   # (HW, HW) f32, trace-time constant

    NC = N * C
    # Block the fused N*C axis: big enough to amortize per-step overhead and feed
    # the MXU full-width rows; >= 2 grid steps when possible (v7x has 2 TCs).
    nc8 = _round_up(NC, 8)
    if nc8 <= 8:
        blk = nc8
    elif nc8 <= 1024:
        blk = _round_up(nc8 // 2, 8)
    else:
        blk = 512
    nc_pad = _round_up(NC, blk)

    x_flat = x.reshape(NC, HW)
    if nc_pad != NC:
        x_flat = jnp.pad(x_flat, ((0, nc_pad - NC), (0, 0)))

    # Explicit VMEM budget: double-buffered in/out tiles + (double-buffered) K^T.
    vmem_bytes = int(2 * 2 * blk * HW * 4 + 2 * HW * HW * 4 + (4 << 20))
    vmem_bytes = min(max(vmem_bytes, 32 << 20), 64 << 20)

    out_flat = pl.pallas_call(
        _spp_kernel,
        out_shape=jax.ShapeDtypeStruct((nc_pad, HW), x.dtype),
        grid_spec=pltpu.PrefetchScalarGridSpec(
            num_scalar_prefetch=0,
            grid=(nc_pad // blk,),
            in_specs=[
                pl.BlockSpec((blk, HW), lambda i: (i, 0)),   # activation tile
                pl.BlockSpec((HW, HW), lambda i: (0, 0)),    # K^T, VMEM-resident
            ],
            out_specs=pl.BlockSpec((blk, HW), lambda i: (i, 0)),
        ),
        compiler_params=pltpu.CompilerParams(
            dimension_semantics=("parallel",),
            vmem_limit_bytes=vmem_bytes),
    )(x_flat, Kt)

    return out_flat[:NC].reshape(N, C, H, W)


# ---------------------------------------------------------------------------
# Pure-JAX reference (per-scale separable form, independent of the Kron fold).
# ---------------------------------------------------------------------------
def _reference(x, scales=(1, 2, 3, 6)):
    N, C, H, W = x.shape
    A_list, B_list = _scale_matrices(H, W, scales)
    out = x.astype(jnp.float32)
    for A, B in zip(A_list, B_list):
        out = out + jnp.einsum(
            "ij,ncjk,lk->ncil",
            jnp.asarray(A, jnp.float32), x.astype(jnp.float32),
            jnp.asarray(B, jnp.float32))
    return out.astype(x.dtype)


if __name__ == "__main__":
    key = jax.random.PRNGKey(0)

    # Primary check: the spec's small shape (N=2, C=4, H=W=16).
    x = jax.random.normal(key, (2, 4, 16, 16), dtype=jnp.float32)
    out = jax.block_until_ready(spatial_pyramid_pooling(x))
    assert out.shape == x.shape and out.dtype == x.dtype
    np.testing.assert_allclose(np.asarray(out), np.asarray(_reference(x)),
                               rtol=1e-4, atol=1e-4)

    # Secondary check: N*C not a multiple of the row block (exercises padding
    # and a multi-step parallel grid).
    x2 = jax.random.normal(jax.random.PRNGKey(0), (3, 5, 16, 16), dtype=jnp.float32)
    out2 = jax.block_until_ready(spatial_pyramid_pooling(x2))
    np.testing.assert_allclose(np.asarray(out2), np.asarray(_reference(x2)),
                               rtol=1e-4, atol=1e-4)

    print("KERNEL_OK")
</pallas_src>

<mosaic_0001>
module attributes {stable_mosaic.version = 11 : i64} {
  func.func @_spp_kernel(%arg0: i32, %arg1: memref<8x256xf32, #tpu.memory_space<vmem>>, %arg2: memref<256x256xf32, #tpu.memory_space<vmem>>, %arg3: memref<8x256xf32, #tpu.memory_space<vmem>>) attributes {dimension_semantics = [#tpu.dimension_semantics<parallel>], iteration_bounds = array<i64: 1>, scalar_prefetch = 0 : i64, scratch_operands = 0 : i64, tpu.core_type = #tpu.core_type<tc>, window_params = [{transform_indices = @transform_0, window_bounds = array<i64: 8, 256>}, {pipeline_mode = #tpu.pipeline_mode<synchronous>, transform_indices = @transform_1, window_bounds = array<i64: 256, 256>}, {transform_indices = @transform_2, window_bounds = array<i64: 8, 256>}]} {
    %c0 = arith.constant 0 : index
    %c0_0 = arith.constant 0 : index
    %0 = vector.load %arg1[%c0, %c0_0] : memref<8x256xf32, #tpu.memory_space<vmem>>, vector<8x256xf32>
    %c0_1 = arith.constant 0 : index
    %c0_2 = arith.constant 0 : index
    %1 = vector.load %arg2[%c0_1, %c0_2] : memref<256x256xf32, #tpu.memory_space<vmem>>, vector<256x256xf32>
    %cst = arith.constant dense<0.000000e+00> : vector<8x256xf32>
    %2 = tpu.matmul %0, %1, %cst {dimension_numbers = #tpu.dot_dimension_numbers<[1], [0], [0], [1], [0, 0, 1, 1], [], []>} : vector<8x256xf32>, vector<256x256xf32>, vector<8x256xf32> -> vector<8x256xf32>
    %c0_3 = arith.constant 0 : index
    %c0_4 = arith.constant 0 : index
    %3 = vector.load %arg3[%c0_3, %c0_4] : memref<8x256xf32, #tpu.memory_space<vmem>>, vector<8x256xf32>
    tpu.vector_store %arg3[%c0_3, %c0_4], %2 {strides = array<i32>} : memref<8x256xf32, #tpu.memory_space<vmem>>, vector<8x256xf32>,
    return
  }
  func.func @transform_0(%arg0: i32) -> (i32, i32) {
    %c0_i32 = arith.constant 0 : i32
    %c0_i32_0 = arith.constant 0 : i32
    return %arg0, %c0_i32 : i32, i32
  }
  func.func @transform_1(%arg0: i32) -> (i32, i32) {
    %c0_i32 = arith.constant 0 : i32
    %c0_i32_0 = arith.constant 0 : i32
    %c0_i32_1 = arith.constant 0 : i32
    return %c0_i32, %c0_i32_0 : i32, i32
  }
  func.func @transform_2(%arg0: i32) -> (i32, i32) {
    %c0_i32 = arith.constant 0 : i32
    %c0_i32_0 = arith.constant 0 : i32
    return %arg0, %c0_i32 : i32, i32
  }
}

</mosaic_0001>

<bundles_post_ra>
// kernel: spatial_pyramid_pooling.1
= control target key start
LH: loop header
LB: loop body
LE: loop exit
PB: predicated region body
PF: predicated region fallthrough
CT: control target
= control target key end

     0   :  { %7 = vsyncpa [#allocation3], 0  ;;  %s209_s12 = smov [#allocation2]   ;;  %s210_s14 = smov 256   ;;  %s242_s0 = inlined_call_operand.vmem [shape: f32[8,256], index: 0, kind: input, shape index: {}]   ;;  %s243_s1 = inlined_call_operand.hbm [shape: f32[256,256], index: 1, kind: input, shape index: {}]   ;;  %s244_s2 = inlined_call_operand.vmem [shape: f32[8,256], index: 2, kind: output, shape index: {}]  }
   0x1   :  { %s14_s11 = sshll.u32 %s243_s1, 4  ;;  %s16_s13 = sshll.u32 %s209_s12, 4  ;;  %s15_s11 = int_to_ptr.hbm [resolvable:$true] %s14_s11  ;;  %s17_s13 = int_to_ptr.vmem [resolvable:$true] %s16_s13 }
   0x2   :  { %s211_s15 = smov 16  }
   0x3   :  { %22 = dma.hbm_to_vmem [thread:$0]  %s15_s11, 8192, %s17_s13, [#allocation3], %s210_s14, %s210_s14, %s211_s15  }
   0x4   :  { %207 = dma.done.wait [#allocation3], 8192  }
   0x5   :  { %208 = vsyncadd [#allocation3], 4294959104  ;;  %v60_v0 = vld [vmem:[#allocation2 + $0xf8] sm:$0xff]  ;;  %v58_v2 = vld [vmem:[#allocation2 + $0xe8] sm:$0xff] }
   0x6   :  { %v92_v1 = vld [vmem:[#allocation2 + $0x1f8] sm:$0xff]  ;;  %133 = vmatpush.msra.mxu2 %v60_v0  ;;  %v90_v3 = vld [vmem:[#allocation2 + $0x1e8] sm:$0xff]  ;;  %v59_v6 = vld [vmem:[#allocation2 + $0xf0] sm:$0xff] }
   0x7   :  { %153 = vmatpush.msra.mxu3 %v92_v1  ;;  %v56_v4 = vld [vmem:[#allocation2 + $0xd8] sm:$0xff]  ;;  %v91_v7 = vld [vmem:[#allocation2 + $0x1f0] sm:$0xff]  ;;  %v57_v8 = vld [vmem:[#allocation2 + $0xe0] sm:$0xff]  ;;  %93 = vmatpush.msra.mxu0 %v59_v6 }
   0x8   :  { %v88_v5 = vld [vmem:[#allocation2 + $0x1d8] sm:$0xff]  ;;  %134 = vmatpush.msra.mxu2 %v58_v2  ;;  %v89_v9 = vld [vmem:[#allocation2 + $0x1e0] sm:$0xff]  ;;  %113 = vmatpush.msra.mxu1 %v91_v7  ;;  %v54_v10 = vld [vmem:[#allocation2 + $0xc8] sm:$0xff] }
   0x9   :  { %154 = vmatpush.msra.mxu3 %v90_v3  ;;  %v86_v11 = vld [vmem:[#allocation2 + $0x1c8] sm:$0xff]  ;;  %v55_v12 = vld [vmem:[#allocation2 + $0xd0] sm:$0xff]  ;;  %94 = vmatpush.msra.mxu0 %v57_v8  ;;  %v52_v14 = vld [vmem:[#allocation2 + $0xb8] sm:$0xff] }
   0xa   :  { %135 = vmatpush.msra.mxu2 %v56_v4  ;;  %v87_v13 = vld [vmem:[#allocation2 + $0x1d0] sm:$0xff]  ;;  %114 = vmatpush.msra.mxu1 %v89_v9  ;;  %v84_v15 = vld [vmem:[#allocation2 + $0x1b8] sm:$0xff]  ;;  %v53_v16 = vld [vmem:[#allocation2 + $0xc0] sm:$0xff] }
   0xb   :  { %155 = vmatpush.msra.mxu3 %v88_v5  ;;  %v85_v17 = vld [vmem:[#allocation2 + $0x1c0] sm:$0xff]  ;;  %95 = vmatpush.msra.mxu0 %v55_v12  ;;  %v50_v18 = vld [vmem:[#allocation2 + $0xa8] sm:$0xff]  ;;  %v51_v20 = vld [vmem:[#allocation2 + $0xb0] sm:$0xff] }
   0xc   :  { %136 = vmatpush.msra.mxu2 %v54_v10  ;;  %115 = vmatpush.msra.mxu1 %v87_v13  ;;  %v82_v19 = vld [vmem:[#allocation2 + $0x1a8] sm:$0xff]  ;;  %v83_v21 = vld [vmem:[#allocation2 + $0x1b0] sm:$0xff]  ;;  %v48_v22 = vld [vmem:[#allocation2 + $0x98] sm:$0xff] }
   0xd   :  { %156 = vmatpush.msra.mxu3 %v86_v11  ;;  %96 = vmatpush.msra.mxu0 %v53_v16  ;;  %v80_v23 = vld [vmem:[#allocation2 + $0x198] sm:$0xff]  ;;  %v49_v24 = vld [vmem:[#allocation2 + $0xa0] sm:$0xff]  ;;  %v46_v26 = vld [vmem:[#allocation2 + $0x88] sm:$0xff] }
   0xe   :  { %137 = vmatpush.msra.mxu2 %v52_v14  ;;  %116 = vmatpush.msra.mxu1 %v85_v17  ;;  %v81_v25 = vld [vmem:[#allocation2 + $0x1a0] sm:$0xff]  ;;  %v78_v27 = vld [vmem:[#allocation2 + $0x188] sm:$0xff]  ;;  %v47_v28 = vld [vmem:[#allocation2 + $0x90] sm:$0xff] }
   0xf   :  { %157 = vmatpush.msra.mxu3 %v84_v15  ;;  %97 = vmatpush.msra.mxu0 %v51_v20  ;;  %v79_v29 = vld [vmem:[#allocation2 + $0x190] sm:$0xff]  ;;  %v44_v30 = vld [vmem:[#allocation2 + $0x78] sm:$0xff]  ;;  %v45_v32 = vld [vmem:[#allocation2 + $0x80] sm:$0xff] }
  0x10   :  { %138 = vmatpush.msra.mxu2 %v50_v18  ;;  %117 = vmatpush.msra.mxu1 %v83_v21  ;;  %v76_v31 = vld [vmem:[#allocation2 + $0x178] sm:$0xff]  ;;  %v77_v33 = vld [vmem:[#allocation2 + $0x180] sm:$0xff]  ;;  %v42_v34 = vld [vmem:[#allocation2 + $0x68] sm:$0xff] }
  0x11   :  { %158 = vmatpush.msra.mxu3 %v82_v19  ;;  %98 = vmatpush.msra.mxu0 %v49_v24  ;;  %v74_v35 = vld [vmem:[#allocation2 + $0x168] sm:$0xff]  ;;  %v43_v36 = vld [vmem:[#allocation2 + $0x70] sm:$0xff]  ;;  %v40_v38 = vld [vmem:[#allocation2 + $0x58] sm:$0xff] }
  0x12   :  { %139 = vmatpush.msra.mxu2 %v48_v22  ;;  %118 = vmatpush.msra.mxu1 %v81_v25  ;;  %v75_v37 = vld [vmem:[#allocation2 + $0x170] sm:$0xff]  ;;  %v72_v39 = vld [vmem:[#allocation2 + $0x158] sm:$0xff]  ;;  %v41_v40 = vld [vmem:[#allocation2 + $0x60] sm:$0xff] }
  0x13   :  { %159 = vmatpush.msra.mxu3 %v80_v23  ;;  %99 = vmatpush.msra.mxu0 %v47_v28  ;;  %v73_v41 = vld [vmem:[#allocation2 + $0x160] sm:$0xff]  ;;  %v38_v42 = vld [vmem:[#allocation2 + $0x48] sm:$0xff]  ;;  %v39_v44 = vld [vmem:[#allocation2 + $0x50] sm:$0xff] }
  0x14   :  { %140 = vmatpush.msra.mxu2 %v46_v26  ;;  %119 = vmatpush.msra.mxu1 %v79_v29  ;;  %v70_v43 = vld [vmem:[#allocation2 + $0x148] sm:$0xff]  ;;  %v71_v45 = vld [vmem:[#allocation2 + $0x150] sm:$0xff]  ;;  %v36_v46 = vld [vmem:[#allocation2 + $0x38] sm:$0xff] }
  0x15   :  { %160 = vmatpush.msra.mxu3 %v78_v27  ;;  %100 = vmatpush.msra.mxu0 %v45_v32  ;;  %v68_v47 = vld [vmem:[#allocation2 + $0x138] sm:$0xff]  ;;  %v37_v48 = vld [vmem:[#allocation2 + $0x40] sm:$0xff]  ;;  %v34_v50 = vld [vmem:[#allocation2 + $0x28] sm:$0xff] }
  0x16   :  { %141 = vmatpush.msra.mxu2 %v44_v30  ;;  %120 = vmatpush.msra.mxu1 %v77_v33  ;;  %v69_v49 = vld [vmem:[#allocation2 + $0x140] sm:$0xff]  ;;  %v66_v51 = vld [vmem:[#allocation2 + $0x128] sm:$0xff]  ;;  %v35_v52 = vld [vmem:[#allocation2 + $0x30] sm:$0xff] }
  0x17   :  { %161 = vmatpush.msra.mxu3 %v76_v31  ;;  %101 = vmatpush.msra.mxu0 %v43_v36  ;;  %v67_v53 = vld [vmem:[#allocation2 + $0x130] sm:$0xff]  ;;  %v32_v54 = vld [vmem:[#allocation2 + $0x18] sm:$0xff]  ;;  %v33_v56 = vld [vmem:[#allocation2 + $0x20] sm:$0xff] }
  0x18   :  { %142 = vmatpush.msra.mxu2 %v42_v34  ;;  %121 = vmatpush.msra.mxu1 %v75_v37  ;;  %v64_v55 = vld [vmem:[#allocation2 + $0x118] sm:$0xff]  ;;  %v65_v57 = vld [vmem:[#allocation2 + $0x120] sm:$0xff]  ;;  %v30_v58 = vld [vmem:[#allocation2 + $0x8] sm:$0xff] }
  0x19   :  { %162 = vmatpush.msra.mxu3 %v74_v35  ;;  %102 = vmatpush.msra.mxu0 %v41_v40  ;;  %v62_v59 = vld [vmem:[#allocation2 + $0x108] sm:$0xff]  ;;  %v27_v60 = vld [vmem:[%s242_s0] sm:$0xff]  ;;  %v31_v62 = vld [vmem:[#allocation2 + $0x10] sm:$0xff] }
  0x1a   :  { %143 = vmatpush.msra.mxu2 %v40_v38  ;;  %122 = vmatpush.msra.mxu1 %v73_v41  ;;  %v28_v61 = vld [vmem:[%s242_s0 + $0x8] sm:$0xff]  ;;  %v63_v63 = vld [vmem:[#allocation2 + $0x110] sm:$0xff]  ;;  %v29_v0 = vld [vmem:[#allocation2] sm:$0xff] }
  0x1b   :  { %163 = vmatpush.msra.mxu3 %v72_v39  ;;  %103 = vmatpush.msra.mxu0 %v39_v44  ;;  %v61_v1 = vld [vmem:[#allocation2 + $0x100] sm:$0xff] }
  0x1c   :  { %144 = vmatpush.msra.mxu2 %v38_v42  ;;  %123 = vmatpush.msra.mxu1 %v71_v45 }
  0x1d   :  { %164 = vmatpush.msra.mxu3 %v70_v43  ;;  %104 = vmatpush.msra.mxu0 %v37_v48 }
  0x1e   :  { %145 = vmatpush.msra.mxu2 %v36_v46  ;;  %124 = vmatpush.msra.mxu1 %v69_v49 }
  0x1f   :  { %165 = vmatpush.msra.mxu3 %v68_v47  ;;  %105 = vmatpush.msra.mxu0 %v35_v52 }
  0x20   :  { %146 = vmatpush.msra.mxu2 %v34_v50  ;;  %125 = vmatpush.msra.mxu1 %v67_v53 }
  0x21   :  { %166 = vmatpush.msra.mxu3 %v66_v51  ;;  %106 = vmatpush.msra.mxu0 %v33_v56 }
  0x22   :  { %147 = vmatpush.msra.mxu2 %v32_v54  ;;  %126 = vmatpush.msra.mxu1 %v65_v57 }
  0x23   :  { %167 = vmatpush.msra.mxu3 %v64_v55  ;;  %107 = vmatpush.msra.mxu0 %v31_v62 }
  0x24   :  { %148 = vmatpush.msra.mxu2 %v30_v58  ;;  %127 = vmatpush.msra.mxu1 %v63_v63 }
  0x25   :  { %168 = vmatpush.msra.mxu3 %v62_v59  ;;  %149 = vmatmul.f32.vlgmr.msra.gmra.mxu2 %v27_v60 }
  0x26   :  { %169 = vmatmul.f32.vlgmr.msra.gmra.mxu3 %v28_v61  ;;  %108 = vmatpush.msra.mxu0 %v29_v0 }
  0x27   :  { %128 = vmatpush.msra.mxu1 %v61_v1  ;;  %109 = vmatmul.f32.vlgmr.msra.gmra.mxu0 %v27_v60 }
  0x28   :  { %129 = vmatmul.f32.vlgmr.msra.gmra.mxu1 %v28_v61 }
  0xa4   :  { %v110_v2 = vpop.f32.mrf.mxu0 }
  0xa5   :  { %v130_v3 = vpop.f32.mrf.mxu1 }
  0xa6   :  { %v131_v4 = vadd.f32 %v130_v3, %v110_v2 }
  0xa8   :  { %v150_v5 = vpop.f32.mrf.mxu2  ;;  %173 = vst [vmem:[%s244_s2] sm:$0xff] %v131_v4 }
  0xa9   :  { %v170_v6 = vpop.f32.mrf.mxu3 }
  0xaa   :  { %v171_v7 = vadd.f32 %v170_v6, %v150_v5 }
  0xac   :  { %174 = vst [vmem:[%s244_s2 + $0x8] sm:$0xff] %v171_v7 }
  0xad   :  { %179 = vsyncpa [#allocation3], 1 }

</bundles_post_ra>
